<compile_context>
chip_gen: v6e
topology: v6e:2x2x1
jax: 0.10.0
libtpu: 0.0.40
codegen_flags: <defaults>
</compile_context>

<pallas_src>
import functools

import jax
import jax.numpy as jnp
from jax import lax
from jax.experimental import pallas as pl
from jax.experimental.pallas import tpu as pltpu


def _choose_b_blk(batch: int, d: int) -> int:
    """How many batch elements each grid step processes.

    Prefer blocks of >= 8 batch elements whose lane width (b_blk * d) is 128-aligned
    (lane-dense loads/stores), while keeping >= 2 grid blocks so
    dimension_semantics=("parallel",) can shard the grid across v7x's two TensorCores.
    Fall back to a single block covering the whole batch (block dims == full array
    dims, which is always a legal BlockSpec).
    """
    for cand in (32, 16, 8):
        if batch % cand == 0 and (cand * d) % 128 == 0 and batch // cand >= 2:
            return cand
    return batch


def _self_seq_atten_kernel(h_ref, mask_ref, o_ref, *, b_blk: int, d: int):
    # h_ref:    (c_len, b_blk * d)  -- b_blk batch elements side by side (lane-dense)
    # mask_ref: (b_blk, c_len)
    # o_ref:    (c_len, b_blk * d)
    c_len = h_ref.shape[0]
    h_all = h_ref[...]                                    # one lane-dense load per step

    # Hoisted out of the unrolled loop (JAX does not CSE broadcast_in_dim).
    row = lax.broadcasted_iota(jnp.int32, (c_len, c_len), 0)
    col = lax.broadcasted_iota(jnp.int32, (c_len, c_len), 1)
    diag = row == col

    outs = []
    for b in range(b_blk):                                # static unroll over the batch block
        hb = h_all[:, b * d:(b + 1) * d]                  # (c_len, d) static lane slice
        hb_bf = hb.astype(jnp.bfloat16)                   # bf16 MXU operands, f32 accumulate

        # alpha = hb @ hb^T without materializing a transpose (contract on d of both).
        alpha = lax.dot_general(
            hb_bf, hb_bf,
            dimension_numbers=(((1,), (1,)), ((), ())),
            preferred_element_type=jnp.float32)           # (c_len, c_len) f32

        # diagonal -> 0.0 (masked_fill_ with eye, BEFORE the -inf mask)
        alpha = jnp.where(diag, 0.0, alpha)

        # columns where h_mask == 0 -> -inf
        col_invalid = mask_ref[b:b + 1, :] == 0           # (1, c_len) broadcasts over rows
        alpha = jnp.where(col_invalid, -jnp.inf, alpha)
        # NOTE: a fully-padded sequence (all-zero mask row) yields NaN rows, exactly
        # matching the PyTorch reference (softmax over an all -inf row).

        # softmax over the key axis
        m = jnp.max(alpha, axis=-1, keepdims=True)
        e = jnp.exp(alpha - m)
        s = jnp.sum(e, axis=-1, keepdims=True)
        p = e * pl.reciprocal(s, approx=True)             # EUP vrcp; frees VALU slots

        # o = softmax(alpha) @ hb
        outs.append(jnp.dot(p.astype(jnp.bfloat16), hb_bf,
                            preferred_element_type=jnp.float32))

    # Single lane-dense store of the whole (c_len, b_blk*d) tile.
    o_ref[...] = jnp.concatenate(outs, axis=1).astype(o_ref.dtype)


def self_seq_atten(h, h_mask):
    """
    h:      (c_len, batch, input_size) float32
    h_mask: (batch, c_len)             0 = padding
    returns (c_len, batch, input_size)
    """
    c_len, batch, d = h.shape
    b_blk = _choose_b_blk(batch, d)
    num_blocks = batch // b_blk

    # Free reshapes (collapse/expand of trailing dims in row-major layout): no HBM copy,
    # unlike the previous wrapper transposes.
    h2d = h.reshape(c_len, batch * d)
    h_mask = h_mask.astype(jnp.int32)

    # TODO(synk): for large c_len add a key-tiled (flash-style) online-softmax path so
    # the (c_len x c_len) score tile stays bounded within v7x's smaller (64 MiB) VMEM.
    out2d = pl.pallas_call(
        functools.partial(_self_seq_atten_kernel, b_blk=b_blk, d=d),
        out_shape=jax.ShapeDtypeStruct((c_len, batch * d), h.dtype),
        grid_spec=pl.GridSpec(
            grid=(num_blocks,),
            in_specs=[
                pl.BlockSpec((c_len, b_blk * d), lambda i: (0, i)),
                pl.BlockSpec((b_blk, c_len), lambda i: (i, 0)),
            ],
            out_specs=pl.BlockSpec((c_len, b_blk * d), lambda i: (0, i)),
        ),
        compiler_params=pltpu.CompilerParams(
            dimension_semantics=("parallel",)),
    )(h2d, h_mask)

    return out2d.reshape(c_len, batch, d)


def _reference(h, h_mask):
    # pure-JAX f32 replica of the PyTorch forward for verification
    c_len = h.shape[0]
    hb = jnp.transpose(h, (1, 0, 2))
    alpha = jnp.einsum('bid,bjd->bij', hb, hb)
    eye = jnp.eye(c_len, dtype=bool)[None]
    alpha = jnp.where(eye, 0.0, alpha)
    mask = (h_mask == 0)[:, None, :]
    alpha = jnp.where(mask, -jnp.inf, alpha)
    p = jax.nn.softmax(alpha, axis=2)
    o = jnp.einsum('bij,bjd->bid', p, hb)
    return jnp.transpose(o, (1, 0, 2))


if __name__ == "__main__":
    key = jax.random.PRNGKey(0)
    c_len, batch, d = 8, 2, 32
    k1, _ = jax.random.split(key)
    h = jax.random.normal(k1, (c_len, batch, d), dtype=jnp.float32)
    # mask: each batch element has its first few positions valid (avoid all-padded rows)
    lengths = jnp.array([6, 8], dtype=jnp.int32)
    h_mask = (jnp.arange(c_len)[None, :] < lengths[:, None]).astype(jnp.int32)  # (batch, c_len)

    out = jax.block_until_ready(self_seq_atten(h, h_mask))
    ref = _reference(h, h_mask)

    assert out.shape == (c_len, batch, d)
    # bf16 MXU operands + approx reciprocal => loosened tolerance vs the f32 reference
    assert jnp.allclose(out, ref, atol=5e-2, rtol=5e-2), "mismatch vs reference"
    print("KERNEL_OK")
</pallas_src>

<mosaic_0001>
module attributes {stable_mosaic.version = 11 : i64} {
  func.func @_self_seq_atten_kernel(%arg0: i32, %arg1: memref<8x64xf32, #tpu.memory_space<vmem>>, %arg2: memref<2x8xi32, #tpu.memory_space<vmem>>, %arg3: memref<8x64xf32, #tpu.memory_space<vmem>>) attributes {dimension_semantics = [#tpu.dimension_semantics<parallel>], iteration_bounds = array<i64: 1>, scalar_prefetch = 0 : i64, scratch_operands = 0 : i64, tpu.core_type = #tpu.core_type<tc>, window_params = [{transform_indices = @transform_0, window_bounds = array<i64: 8, 64>}, {transform_indices = @transform_1, window_bounds = array<i64: 2, 8>}, {transform_indices = @transform_2, window_bounds = array<i64: 8, 64>}]} {
    %c0 = arith.constant 0 : index
    %c0_0 = arith.constant 0 : index
    %0 = vector.load %arg1[%c0, %c0_0] : memref<8x64xf32, #tpu.memory_space<vmem>>, vector<8x64xf32>
    %1 = tpu.iota {dimensions = array<i32: 0>} : vector<8x8xi32>
    %2 = tpu.iota {dimensions = array<i32: 1>} : vector<8x8xi32>
    %3 = arith.cmpi eq, %1, %2 : vector<8x8xi32>
    %4 = vector.extract_strided_slice %0 {offsets = [0, 0], sizes = [8, 32], strides = [1, 1]} : vector<8x64xf32> to vector<8x32xf32>
    %5 = arith.truncf %4 : vector<8x32xf32> to vector<8x32xbf16>
    %cst = arith.constant dense<0.000000e+00> : vector<8x8xf32>
    %6 = tpu.matmul %5, %5, %cst {dimension_numbers = #tpu.dot_dimension_numbers<[1], [1], [0], [0], [0, 0, 1, 0], [], []>} : vector<8x32xbf16>, vector<8x32xbf16>, vector<8x8xf32> -> vector<8x8xf32>
    %cst_1 = arith.constant 0.000000e+00 : f32
    %7 = vector.broadcast %cst_1 : f32 to vector<8x8xf32>
    %8 = arith.select %3, %7, %6 : vector<8x8xi1>, vector<8x8xf32>
    %c0_2 = arith.constant 0 : index
    %c0_3 = arith.constant 0 : index
    %9 = vector.load %arg2[%c0_2, %c0_3] : memref<2x8xi32, #tpu.memory_space<vmem>>, vector<1x8xi32>
    %c0_i32 = arith.constant 0 : i32
    %10 = vector.broadcast %c0_i32 : i32 to vector<1x8xi32>
    %11 = arith.cmpi eq, %9, %10 : vector<1x8xi32>
    %cst_4 = arith.constant 0xFF800000 : f32
    %12 = vector.shape_cast %11 : vector<1x8xi1> to vector<1x8xi1>
    %13 = vector.broadcast %12 : vector<1x8xi1> to vector<8x8xi1>
    %14 = vector.broadcast %cst_4 : f32 to vector<8x8xf32>
    %15 = arith.select %13, %14, %8 : vector<8x8xi1>, vector<8x8xf32>
    %cst_5 = arith.constant dense<0xFF800000> : vector<8xf32>
    %16 = vector.multi_reduction <maximumf>, %15, %cst_5 [1] : vector<8x8xf32> to vector<8xf32>
    %17 = vector.shape_cast %16 : vector<8xf32> to vector<8x1xf32>
    %18 = vector.broadcast %17 : vector<8x1xf32> to vector<8x8xf32>
    %19 = arith.subf %15, %18 : vector<8x8xf32>
    %20 = math.exp %19 : vector<8x8xf32>
    %cst_6 = arith.constant dense<0.000000e+00> : vector<8xf32>
    %21 = vector.multi_reduction <add>, %20, %cst_6 [1] : vector<8x8xf32> to vector<8xf32>
    %22 = vector.shape_cast %21 : vector<8xf32> to vector<8x1xf32>
    %23 = tpu.reciprocal %22 {approx = true} : vector<8x1xf32> -> vector<8x1xf32>
    %24 = vector.broadcast %23 : vector<8x1xf32> to vector<8x8xf32>
    %25 = arith.mulf %20, %24 : vector<8x8xf32>
    %26 = arith.truncf %25 : vector<8x8xf32> to vector<8x8xbf16>
    %cst_7 = arith.constant dense<0.000000e+00> : vector<8x32xf32>
    %27 = tpu.matmul %26, %5, %cst_7 {dimension_numbers = #tpu.dot_dimension_numbers<[1], [0], [0], [1], [0, 0, 1, 1], [], []>} : vector<8x8xbf16>, vector<8x32xbf16>, vector<8x32xf32> -> vector<8x32xf32>
    %28 = vector.extract_strided_slice %0 {offsets = [0, 32], sizes = [8, 32], strides = [1, 1]} : vector<8x64xf32> to vector<8x32xf32>
    %29 = arith.truncf %28 : vector<8x32xf32> to vector<8x32xbf16>
    %cst_8 = arith.constant dense<0.000000e+00> : vector<8x8xf32>
    %30 = tpu.matmul %29, %29, %cst_8 {dimension_numbers = #tpu.dot_dimension_numbers<[1], [1], [0], [0], [0, 0, 1, 0], [], []>} : vector<8x32xbf16>, vector<8x32xbf16>, vector<8x8xf32> -> vector<8x8xf32>
    %cst_9 = arith.constant 0.000000e+00 : f32
    %31 = vector.broadcast %cst_9 : f32 to vector<8x8xf32>
    %32 = arith.select %3, %31, %30 : vector<8x8xi1>, vector<8x8xf32>
    %c1 = arith.constant 1 : index
    %c0_10 = arith.constant 0 : index
    %33 = vector.load %arg2[%c1, %c0_10] : memref<2x8xi32, #tpu.memory_space<vmem>>, vector<1x8xi32>
    %c0_i32_11 = arith.constant 0 : i32
    %34 = vector.broadcast %c0_i32_11 : i32 to vector<1x8xi32>
    %35 = arith.cmpi eq, %33, %34 : vector<1x8xi32>
    %cst_12 = arith.constant 0xFF800000 : f32
    %36 = vector.shape_cast %35 : vector<1x8xi1> to vector<1x8xi1>
    %37 = vector.broadcast %36 : vector<1x8xi1> to vector<8x8xi1>
    %38 = vector.broadcast %cst_12 : f32 to vector<8x8xf32>
    %39 = arith.select %37, %38, %32 : vector<8x8xi1>, vector<8x8xf32>
    %cst_13 = arith.constant dense<0xFF800000> : vector<8xf32>
    %40 = vector.multi_reduction <maximumf>, %39, %cst_13 [1] : vector<8x8xf32> to vector<8xf32>
    %41 = vector.shape_cast %40 : vector<8xf32> to vector<8x1xf32>
    %42 = vector.broadcast %41 : vector<8x1xf32> to vector<8x8xf32>
    %43 = arith.subf %39, %42 : vector<8x8xf32>
    %44 = math.exp %43 : vector<8x8xf32>
    %cst_14 = arith.constant dense<0.000000e+00> : vector<8xf32>
    %45 = vector.multi_reduction <add>, %44, %cst_14 [1] : vector<8x8xf32> to vector<8xf32>
    %46 = vector.shape_cast %45 : vector<8xf32> to vector<8x1xf32>
    %47 = tpu.reciprocal %46 {approx = true} : vector<8x1xf32> -> vector<8x1xf32>
    %48 = vector.broadcast %47 : vector<8x1xf32> to vector<8x8xf32>
    %49 = arith.mulf %44, %48 : vector<8x8xf32>
    %50 = arith.truncf %49 : vector<8x8xf32> to vector<8x8xbf16>
    %cst_15 = arith.constant dense<0.000000e+00> : vector<8x32xf32>
    %51 = tpu.matmul %50, %29, %cst_15 {dimension_numbers = #tpu.dot_dimension_numbers<[1], [0], [0], [1], [0, 0, 1, 1], [], []>} : vector<8x8xbf16>, vector<8x32xbf16>, vector<8x32xf32> -> vector<8x32xf32>
    %52 = tpu.concatenate %27, %51 in 1 : vector<8x32xf32>, vector<8x32xf32> -> vector<8x64xf32>
    %c0_16 = arith.constant 0 : index
    %c0_17 = arith.constant 0 : index
    %53 = vector.load %arg3[%c0_16, %c0_17] : memref<8x64xf32, #tpu.memory_space<vmem>>, vector<8x64xf32>
    tpu.vector_store %arg3[%c0_16, %c0_17], %52 {strides = array<i32>} : memref<8x64xf32, #tpu.memory_space<vmem>>, vector<8x64xf32>,
    return
  }
  func.func @transform_0(%arg0: i32) -> (i32, i32) {
    %c0_i32 = arith.constant 0 : i32
    %c0_i32_0 = arith.constant 0 : i32
    return %c0_i32, %arg0 : i32, i32
  }
  func.func @transform_1(%arg0: i32) -> (i32, i32) {
    %c0_i32 = arith.constant 0 : i32
    %c0_i32_0 = arith.constant 0 : i32
    return %arg0, %c0_i32 : i32, i32
  }
  func.func @transform_2(%arg0: i32) -> (i32, i32) {
    %c0_i32 = arith.constant 0 : i32
    %c0_i32_0 = arith.constant 0 : i32
    return %c0_i32, %arg0 : i32, i32
  }
}

</mosaic_0001>

<bundles_post_ra>
// kernel: tpu_custom_call.1
= control target key start
LH: loop header
LB: loop body
LE: loop exit
PB: predicated region body
PF: predicated region fallthrough
CT: control target
= control target key end

     0   :  { %7 = vsyncpa [#allocation3], 0  ;;  %s460_s0 = inlined_call_operand.hbm [shape: f32[8,64], index: 0, kind: input, shape index: {}]   ;;  %s461_s1 = inlined_call_operand.hbm [shape: s32[2,8], index: 1, kind: input, shape index: {}]   ;;  %s462_s2 = inlined_call_operand.hbm [shape: f32[8,64], index: 2, kind: output, shape index: {}]  }
   0x1   :  { %8 = vsyncpa [#allocation6], 0 }
   0x2   :  { %9 = vsyncpa [#allocation4], 0  ;;  %s411_s9 = smov [#allocation2]   ;;  %s412_s11 = smov [#allocation5]  }
   0x3   :  { %s16_s10 = sshll.u32 %s411_s9, 4  ;;  %s26_s12 = sshll.u32 %s412_s11, 4  ;;  %s17_s10 = int_to_ptr.vmem [resolvable:$true] %s16_s10  ;;  %s27_s12 = int_to_ptr.vmem [resolvable:$true] %s26_s12 }
   0x4   :  { %s353_s13 = scalar_lea.vmem %s17_s10, 128  ;;  %p358_p1 = scmp.lt.s32.totalorder %s17_s10, %s17_s10 }
   0x5   :  { %p354_p0 = scmp.ne.s32.totalorder %s17_s10, %s353_s13  ;;  %p359_p2 = scmp.lt.s32.totalorder %s353_s13, %s353_s13 }
   0x7   :  { %p360_p3 = por %p359_p2, %p358_p1 }
   0x9   :  { %p361_p4 = pnand %p360_p3, %p354_p0 }
   0xb   :  { %364 = shalt.err (!%p361_p4)
}
   0xc   :  { %19 = dma.hbm_to_vmem [thread:$0]  %s460_s0, 128, %s17_s10, [#allocation3]  }
   0xd   :  { %s373_s16 = scalar_lea.vmem %s27_s12, 32  ;;  %p378_p6 = scmp.lt.s32.totalorder %s27_s12, %s27_s12 }
   0xe   :  { %p374_p5 = scmp.ne.s32.totalorder %s27_s12, %s373_s16  ;;  %p379_p7 = scmp.lt.s32.totalorder %s373_s16, %s373_s16 }
  0x10   :  { %p380_p8 = por %p379_p7, %p378_p6 }
  0x12   :  { %p381_p9 = pnand %p380_p8, %p374_p5 }
  0x14   :  { %384 = shalt.err (!%p381_p9)
}
  0x15   :  { %29 = dma.hbm_to_vmem [thread:$0]  %s461_s1, 32, %s27_s12, [#allocation6]  }
  0x16   :  { %405 = dma.done.wait [#allocation3], 128  }
  0x17   :  { %406 = vsyncadd [#allocation3], 4294967168 }
  0x18   :  { %407 = dma.done.wait [#allocation6], 32  }
  0x19   :  { %408 = vsyncadd [#allocation6], 4294967264  ;;  %v413_v0 = vmov 0.0   ;;  %vm414_vm0 = vmmov 0   ;;  %v37_v1 = vld [vmem:[#allocation2] sm:$0xff]  ;;  %vm44_vm1 = vcmask 261120   ;;  %v38_v4 = vlaneseq }
  0x1a   :  { %305 = vmatprep.subr.bf16.mxu0 %v413_v0  ;;  %307 = vmatprep.mubr.msk.bf16.mxu0 %vm414_vm0, %v413_v0  ;;  %v43_v2 = vpack.c.bf16 %v37_v1, %v37_v1  ;;  %v89_v5 = vld [vmem:[#allocation5] sm:$0x1]  ;;  %v415_v8 = vmov 0   ;;  %vm98_vm5 = vcmask 64512   ;;  %s416_s0 = smov 96   ;;  %vm114_vm6 = vcmask 1043456  }
  0x1b   :  { %311 = vmatprep.subr.bf16.mxu1 %v413_v0  ;;  %313 = vmatprep.mubr.msk.bf16.mxu1 %vm414_vm0, %v413_v0  ;;  %v39_v6 = vshrl.u32 %v38_v4, 7  ;;  %vm90_vm2 = vcmp.eq.s32.totalorder %v89_v5, 0  ;;  %v41_v10 = vand.u32 127, %v38_v4  ;;  %v204_v32 = vld [vmem:[#allocation5 + $0x1] sm:$0x1]  ;;  %s417_s1 = smov 32  }
  0x1c   :  { %v46_v3 = vsel %vm44_vm1, %v43_v2, 0  ;;  %v91_v9 = vsel %vm90_vm2, 1, %v415_v8  ;;  %158 = vrot.lane.b32.xlu1 %v43_v2, %s416_s0  ;;  %v115_v24 = vsel %vm114_vm6, %v43_v2, 0  ;;  %vm205_vm7 = vcmp.eq.s32.totalorder %v204_v32, 0  ;;  %s418_s19 = smov [#allocation7]  }
  0x1d   :  { %306 = vmatpush3.bf16.xpose.msra.mxu0 %v46_v3  ;;  %v94_v7 = vsub.s32 0, %v39_v6  ;;  %vm42_vm3 = vcmp.eq.s32.totalorder %v39_v6, %v41_v10  ;;  %312 = vmatpush3.bf16.msra.mxu1 %v115_v24  ;;  %v206_v34 = vsel %vm205_vm7, 1, %v415_v8  ;;  %s283_s20 = sshll.u32 %s418_s19, 4  ;;  %vm275_vm9 = vcmask 523264   ;;  %s284_s20 = int_to_ptr.vmem [resolvable:$true] %s283_s20 }
  0x1e   :  { %323 = vmatprep.subr.bf16.mxu0 %v413_v0  ;;  %317 = vmatprep.subr.bf16.mxu1 %v413_v0  ;;  %s385_s21 = scalar_lea.vmem %s284_s20, 128  ;;  %p390_p11 = scmp.lt.s32.totalorder %s284_s20, %s284_s20 }
  0x1f   :  { %v95_v11 = vrot.slane %v91_v9, %v94_v7  ;;  %v210_v36 = vrot.slane %v206_v34, %v94_v7  ;;  %p386_p10 = scmp.ne.s32.totalorder %s284_s20, %s385_s21  ;;  %p391_p12 = scmp.lt.s32.totalorder %s385_s21, %s385_s21 }
  0x21   :  { %vm96_vm4 = vcmp.eq.s32.totalorder %v95_v11, 1  ;;  %vm211_vm8 = vcmp.eq.s32.totalorder %v210_v36, 1  ;;  %p392_p13 = por %p391_p12, %p390_p11 }
  0x23   :  { %p393_p0 = pnand %p392_p13, %p386_p10 }
  0x24   :  { %308 = vmatmul.mubr.msk.bf16.vlgmr.msra.gmra.mxu0 %vm44_vm1, %v43_v2 }
  0x25   :  { %325 = vmatprep.mubr.msk.bf16.mxu0 %vm414_vm0, %v413_v0 }
  0x8e   :  { %v159_v25 = vpop.permute.xlu1 %158 }
  0x8f   :  { %v228_v26 = vsel %vm114_vm6, %v159_v25, 0  ;;  %v161_v31 = vsel %vm44_vm1, %v159_v25, 0 }
  0x90   :  { %324 = vmatpush3.bf16.msra.mxu0 %v228_v26 }
  0xe4   :  { %v82_v12 = vpop.f32.mrf.mxu0 }
  0xe5   :  { %v88_v13 = vsel %vm42_vm3, 0.0, %v82_v12 }
  0xe6   :  { %v309_v14 = vpop.f32.mrf.mxu0  ;;  %v97_v15 = vsel %vm96_vm4, -inf, %v88_v13 }
  0xe7   :  { %v99_v16 = vsel %vm98_vm5, %v97_v15, -inf }
  0xe8   :  { %100 = vmax.xlane.f32.xlu0 %v99_v16  ;;  %v85_v17 = vpop.f32.mrf.mxu0 }
  0xea   :  { %v310_v18 = vpop.f32.mrf.mxu0 }
 0x171   :  { %v101_v19 = vpop.xlane.xlu0 %100 }
 0x172   :  { %v102_v20 = vsub.f32 %v97_v15, %v101_v19 }
 0x174   :  { %v103_v21 = vmul.f32 1.442695, %v102_v20 }
 0x176   :  { %337 = vpow2.f32 %v103_v21 }
 0x183   :  { %v338_v22 = vpop.eup %337 }
 0x184   :  { %v105_v23 = vsel %vm98_vm5, %v338_v22, 0.0 }
 0x185   :  { %106 = vadd.xlane.f32.xlu0 %v105_v23 }
 0x20e   :  { %v107_v27 = vpop.xlane.xlu0 %106 }
 0x20f   :  { %339 = vrcp.f32 %v107_v27 }
 0x21c   :  { %v340_v28 = vpop.eup %339 }
 0x21d   :  { %v109_v29 = vmul.f32 %v340_v28, %v338_v22 }
 0x21f   :  { %v110_v30 = vpack.c.bf16 %v109_v29, %v109_v29 }
 0x221   :  { %314 = vmatmul.mubr.msk.bf16.vlgmr.msra.gmra.mxu1 %vm98_vm5, %v110_v30 }
 0x222   :  { %318 = vmatpush3.bf16.xpose.msra.mxu1 %v161_v31  ;;  %319 = vmatprep.mubr.msk.bf16.mxu1 %vm414_vm0, %v413_v0 }
 0x229   :  { %320 = vmatmul.mubr.msk.bf16.vlgmr.msra.gmra.mxu1 %vm44_vm1, %v159_v25 }
 0x2e1   :  { %v151_v33 = vpop.f32.mrf.mxu1 }
 0x2e3   :  { %v315_v35 = vpop.f32.mrf.mxu1 }
 0x2e5   :  { %v154_v37 = vpop.f32.mrf.mxu1 }
 0x2e7   :  { %v316_v38 = vpop.f32.mrf.mxu1 }
 0x2e9   :  { %v197_v39 = vpop.f32.mrf.mxu1 }
 0x2ea   :  { %v203_v40 = vsel %vm42_vm3, 0.0, %v197_v39 }
 0x2eb   :  { %v321_v41 = vpop.f32.mrf.mxu1  ;;  %v212_v42 = vsel %vm211_vm8, -inf, %v203_v40 }
 0x2ec   :  { %v213_v43 = vsel %vm98_vm5, %v212_v42, -inf }
 0x2ed   :  { %214 = vmax.xlane.f32.xlu1 %v213_v43  ;;  %v200_v44 = vpop.f32.mrf.mxu1 }
 0x2ef   :  { %v322_v45 = vpop.f32.mrf.mxu1 }
 0x376   :  { %v215_v46 = vpop.xlane.xlu1 %214 }
 0x377   :  { %v216_v47 = vsub.f32 %v212_v42, %v215_v46 }
 0x379   :  { %v217_v48 = vmul.f32 1.442695, %v216_v47 }
 0x37b   :  { %341 = vpow2.f32 %v217_v48 }
 0x388   :  { %v342_v49 = vpop.eup %341 }
 0x389   :  { %v219_v50 = vsel %vm98_vm5, %v342_v49, 0.0 }
 0x38a   :  { %220 = vadd.xlane.f32.xlu0 %v219_v50 }
 0x413   :  { %v221_v51 = vpop.xlane.xlu0 %220 }
 0x414   :  { %343 = vrcp.f32 %v221_v51 }
 0x421   :  { %v344_v52 = vpop.eup %343 }
 0x422   :  { %v223_v53 = vmul.f32 %v344_v52, %v342_v49 }
 0x424   :  { %v224_v54 = vpack.c.bf16 %v223_v53, %v223_v53 }
 0x426   :  { %326 = vmatmul.mubr.msk.bf16.vlgmr.msra.gmra.mxu0 %vm98_vm5, %v224_v54 }
 0x4e6   :  { %v264_v55 = vpop.f32.mrf.mxu0 }
 0x4e7   :  { %271 = vrot.lane.b32.xlu0 %v264_v55, %s417_s1 }
 0x4e8   :  { %v327_v56 = vpop.f32.mrf.mxu0 }
 0x4ea   :  { %v267_v57 = vpop.f32.mrf.mxu0 }
 0x4ec   :  { %v328_v58 = vpop.f32.mrf.mxu0 }
 0x559   :  { %v272_v59 = vpop.permute.xlu0 %271 }
 0x55a   :  { %v274_v60 = vsel %vm44_vm1, %v151_v33, %v272_v59 }
 0x55b   :  { %276 = vst.msk [vmem:[#allocation7] sm:$0xff] %vm275_vm9, %v274_v60 }
 0x55c   :  { %396 = shalt.err (!%p393_p0)
}
 0x55d   :  { %286 = dma.vmem_to_hbm [thread:$0]  %s284_s20, 128, %s462_s2, [#allocation4]  }
 0x55e   :  { %409 = dma.done.wait [#allocation4], 128  }
 0x55f   :  { %410 = vsyncadd [#allocation4], 4294967168 }
 0x560   :  { %290 = vsyncpa [#allocation3], 1 }
 0x561   :  { %291 = vsyncpa [#allocation6], 1 }
 0x562   :  { %292 = vsyncpa [#allocation4], 1 }

</bundles_post_ra>
